<compile_context>
chip_gen: v5e
topology: v5e:2x2
jax: 0.10.0
libtpu: 0.0.40
codegen_flags: <defaults>
</compile_context>

<pallas_src>
import math
import jax
import jax.numpy as jnp
from jax.experimental import pallas as pl
from jax.experimental.pallas import tpu as pltpu


# ------------------------------ helpers -------------------------------------

def _round_up(x, m):
    return ((x + m - 1) // m) * m


def _pick_tile(dim, candidates):
    for t in candidates:
        if dim % t == 0:
            return t
    return dim


_VMEM_LIMIT = 64 * 1024 * 1024  # safely under physical VMEM on v5e/v6e/v7x


# --------------- Pallas kernel 1: feature transform xw = x @ W^T ------------

def _feat_kernel(x_ref, wt_ref, o_ref):
    o_ref[...] = jnp.dot(
        x_ref[...], wt_ref[...], preferred_element_type=jnp.float32
    ).astype(o_ref.dtype)


def feature_transform(x_pad_bf16, wt_pad_bf16):
    """(N_pad, C_in_pad) bf16 @ (C_in_pad, C_out_pad) bf16 -> (N_pad, C_out_pad) bf16."""
    n_pad, c_in_pad = x_pad_bf16.shape
    c_out_pad = wt_pad_bf16.shape[1]
    tm = _pick_tile(n_pad, (512, 256, 128))
    cost = pl.CostEstimate(
        flops=int(2 * n_pad * c_in_pad * c_out_pad),
        transcendentals=0,
        bytes_accessed=int(x_pad_bf16.size * 2 + wt_pad_bf16.size * 2
                           + n_pad * c_out_pad * 2),
    )
    return pl.pallas_call(
        _feat_kernel,
        out_shape=jax.ShapeDtypeStruct((n_pad, c_out_pad), jnp.bfloat16),
        grid_spec=pltpu.PrefetchScalarGridSpec(
            num_scalar_prefetch=0,
            grid=(n_pad // tm,),
            in_specs=[
                pl.BlockSpec((tm, c_in_pad), lambda i: (i, 0)),
                pl.BlockSpec((c_in_pad, c_out_pad), lambda i: (0, 0)),
            ],
            out_specs=pl.BlockSpec((tm, c_out_pad), lambda i: (i, 0)),
        ),
        compiler_params=pltpu.CompilerParams(
            dimension_semantics=("parallel",),
            vmem_limit_bytes=_VMEM_LIMIT,
        ),
        cost_estimate=cost,
    )(x_pad_bf16, wt_pad_bf16)


# --------------- Pallas kernel 2: tiled aggregation A @ xw + b --------------

def _agg_kernel(a_ref, xw_ref, b_ref, o_ref, acc_ref):
    k = pl.program_id(2)

    @pl.when(k == 0)
    def _():
        acc_ref[...] = jnp.zeros_like(acc_ref)

    acc_ref[...] += jnp.dot(
        a_ref[...], xw_ref[...], preferred_element_type=jnp.float32
    )

    @pl.when(k == pl.num_programs(2) - 1)
    def _():
        # bias added once, in the finalize branch only (keeps k-loop pure MXU)
        o_ref[...] = (acc_ref[...] + b_ref[...]).astype(o_ref.dtype)


def aggregate(a_pad_bf16, xw_pad_bf16, bias_pad_f32):
    """Tiled A_norm @ xw + b with an f32 VMEM accumulator."""
    n_pad = a_pad_bf16.shape[0]
    c_out_pad = xw_pad_bf16.shape[1]
    tm = _pick_tile(n_pad, (256, 128))
    tk = _pick_tile(n_pad, (512, 256, 128))
    tn = _pick_tile(c_out_pad, (256, 128))
    cost = pl.CostEstimate(
        flops=int(2 * n_pad * n_pad * c_out_pad),
        transcendentals=0,
        bytes_accessed=int(a_pad_bf16.size * 2 + xw_pad_bf16.size * 2
                           + bias_pad_f32.size * 4 + n_pad * c_out_pad * 4),
    )
    return pl.pallas_call(
        _agg_kernel,
        out_shape=jax.ShapeDtypeStruct((n_pad, c_out_pad), jnp.float32),
        grid_spec=pltpu.PrefetchScalarGridSpec(
            num_scalar_prefetch=0,
            grid=(n_pad // tm, c_out_pad // tn, n_pad // tk),
            in_specs=[
                pl.BlockSpec((tm, tk), lambda i, j, k: (i, k)),   # A tile
                pl.BlockSpec((tk, tn), lambda i, j, k: (k, j)),   # xw tile
                pl.BlockSpec((1, tn), lambda i, j, k: (0, j)),    # bias tile
            ],
            out_specs=pl.BlockSpec((tm, tn), lambda i, j, k: (i, j)),
            scratch_shapes=[pltpu.VMEM((tm, tn), jnp.float32)],
        ),
        compiler_params=pltpu.CompilerParams(
            dimension_semantics=("parallel", "parallel", "arbitrary"),
            vmem_limit_bytes=_VMEM_LIMIT,
        ),
        cost_estimate=cost,
    )(a_pad_bf16, xw_pad_bf16, bias_pad_f32)


# ------------------------------ JAX glue ------------------------------------

def gcn_norm_dense(edge_index, num_nodes):
    """gcn_norm with add_self_loops=False, edge_weight=1, densified to [N, N].

    A_norm[i, j] = sum over edges (j -> i) of deg_inv_sqrt[j] * deg_inv_sqrt[i],
    deg = in-degree over target (col) nodes, matching PyG.
    """
    row = edge_index[0]
    col = edge_index[1]
    ones = jnp.ones(row.shape[0], jnp.float32)
    deg = jnp.zeros((num_nodes,), jnp.float32).at[col].add(ones)
    deg_inv_sqrt = jnp.where(deg > 0, jax.lax.rsqrt(jnp.maximum(deg, 1.0)), 0.0)
    norm = deg_inv_sqrt[row] * deg_inv_sqrt[col]
    a = jnp.zeros((num_nodes, num_nodes), jnp.float32).at[col, row].add(norm)
    return a


def glorot_uniform(key, shape):
    fan_out, fan_in = shape
    limit = math.sqrt(6.0 / (fan_in + fan_out))
    return jax.random.uniform(key, shape, jnp.float32, minval=-limit, maxval=limit)


class GraphConvPallas:
    """Mirror of GraphConv(conv_type='GCNConv', in_channels, out_channels, n_layers)."""

    def __init__(self, in_channels, out_channels, n_layers, key):
        self.in_channels = in_channels
        self.out_channels = out_channels
        self.n_layers = n_layers
        self.params = []
        keys = jax.random.split(key, n_layers)
        c_in = in_channels
        for i in range(n_layers):
            w = glorot_uniform(keys[i], (out_channels, c_in))   # lin.weight (C_out, C_in)
            b = jnp.zeros((out_channels,), jnp.float32)         # PyG bias init = zeros
            self.params.append((w, b))
            c_in = out_channels
        # padded (lane-dense) parameter copies for the kernels
        self.padded_params = []
        for (w, b) in self.params:
            c_out, ci = w.shape
            ci_pad = _round_up(ci, 128)
            co_pad = _round_up(c_out, 128)
            wt_pad = jnp.zeros((ci_pad, co_pad), jnp.float32).at[:ci, :c_out].set(w.T)
            b_pad = jnp.zeros((1, co_pad), jnp.float32).at[0, :c_out].set(b)
            self.padded_params.append((wt_pad.astype(jnp.bfloat16), b_pad))

    def __call__(self, x, edge_index, edge_attr=None):
        # edge_attr is ignored by GCNConv when no edge_weight is supplied (None here).
        n, c_in = x.shape
        n_pad = _round_up(n, 128)

        # normalized dense adjacency, padded and streamed as bf16
        a = gcn_norm_dense(edge_index, n)
        a_pad = jnp.zeros((n_pad, n_pad), jnp.float32).at[:n, :n].set(a)
        a_pad = a_pad.astype(jnp.bfloat16)

        # padded activation (kept padded across layers; padding is inert for the
        # real [:n, :C_out] output because A_pad's padded columns are zero)
        c_in_pad = self.padded_params[0][0].shape[0]
        h = jnp.zeros((n_pad, c_in_pad), jnp.float32).at[:n, :c_in].set(x)

        for (wt_pad, b_pad) in self.padded_params:
            xw = feature_transform(h.astype(jnp.bfloat16), wt_pad)
            h = aggregate(a_pad, xw, b_pad)

        return h[:n, :self.out_channels]


# pure-JAX reference mirroring the kernel's numeric path (bf16 operands, f32 accum)
def reference_forward(model, x, edge_index):
    a = gcn_norm_dense(edge_index, x.shape[0])
    a = a.astype(jnp.bfloat16).astype(jnp.float32)
    h = x
    for (w, b) in model.params:
        xw = jnp.dot(h.astype(jnp.bfloat16).astype(jnp.float32),
                     w.T.astype(jnp.bfloat16).astype(jnp.float32),
                     preferred_element_type=jnp.float32)
        xw = xw.astype(jnp.bfloat16).astype(jnp.float32)
        h = jnp.dot(a, xw, preferred_element_type=jnp.float32) + b[None, :]
    return h


# ------------------------------ main ----------------------------------------

if __name__ == "__main__":
    key = jax.random.PRNGKey(0)
    k_x, k_src, k_dst, k_params = jax.random.split(key, 4)

    num_nodes = 32
    num_edges = 64
    in_channels = 16
    out_channels = 16
    n_layers = 2

    x = jax.random.normal(k_x, (num_nodes, in_channels), jnp.float32)
    src = jax.random.randint(k_src, (num_edges,), 0, num_nodes, jnp.int32)
    dst = jax.random.randint(k_dst, (num_edges,), 0, num_nodes, jnp.int32)
    edge_index = jnp.stack([src, dst], axis=0)  # [2, E]

    model = GraphConvPallas(in_channels, out_channels, n_layers, k_params)

    out = model(x, edge_index)
    out = jax.block_until_ready(out)

    ref = reference_forward(model, x, edge_index)
    assert out.shape == (num_nodes, out_channels)
    assert jnp.allclose(out, ref, atol=2e-3, rtol=2e-3), (
        float(jnp.max(jnp.abs(out - ref))))

    print("KERNEL_OK")
</pallas_src>

<mosaic_0001>
module attributes {stable_mosaic.version = 11 : i64} {
  func.func @_feat_kernel(%arg0: i32, %arg1: memref<128x128xbf16, #tpu.memory_space<vmem>>, %arg2: memref<128x128xbf16, #tpu.memory_space<vmem>>, %arg3: memref<128x128xbf16, #tpu.memory_space<vmem>>) attributes {dimension_semantics = [#tpu.dimension_semantics<parallel>], iteration_bounds = array<i64: 1>, scalar_prefetch = 0 : i64, scratch_operands = 0 : i64, tpu.core_type = #tpu.core_type<tc>, window_params = [{transform_indices = @transform_0, window_bounds = array<i64: 128, 128>}, {pipeline_mode = #tpu.pipeline_mode<synchronous>, transform_indices = @transform_1, window_bounds = array<i64: 128, 128>}, {transform_indices = @transform_2, window_bounds = array<i64: 128, 128>}]} {
    %c0 = arith.constant 0 : index
    %c0_0 = arith.constant 0 : index
    %0 = vector.load %arg1[%c0, %c0_0] : memref<128x128xbf16, #tpu.memory_space<vmem>>, vector<128x128xbf16>
    %c0_1 = arith.constant 0 : index
    %c0_2 = arith.constant 0 : index
    %1 = vector.load %arg2[%c0_1, %c0_2] : memref<128x128xbf16, #tpu.memory_space<vmem>>, vector<128x128xbf16>
    %cst = arith.constant dense<0.000000e+00> : vector<128x128xf32>
    %2 = tpu.matmul %0, %1, %cst {dimension_numbers = #tpu.dot_dimension_numbers<[1], [0], [0], [1], [0, 0, 1, 1], [], []>} : vector<128x128xbf16>, vector<128x128xbf16>, vector<128x128xf32> -> vector<128x128xf32>
    %3 = arith.truncf %2 : vector<128x128xf32> to vector<128x128xbf16>
    %c0_3 = arith.constant 0 : index
    %c0_4 = arith.constant 0 : index
    %4 = vector.load %arg3[%c0_3, %c0_4] : memref<128x128xbf16, #tpu.memory_space<vmem>>, vector<128x128xbf16>
    tpu.vector_store %arg3[%c0_3, %c0_4], %3 {strides = array<i32>} : memref<128x128xbf16, #tpu.memory_space<vmem>>, vector<128x128xbf16>,
    return
  }
  func.func @transform_0(%arg0: i32) -> (i32, i32) {
    %c0_i32 = arith.constant 0 : i32
    %c0_i32_0 = arith.constant 0 : i32
    return %arg0, %c0_i32 : i32, i32
  }
  func.func @transform_1(%arg0: i32) -> (i32, i32) {
    %c0_i32 = arith.constant 0 : i32
    %c0_i32_0 = arith.constant 0 : i32
    %c0_i32_1 = arith.constant 0 : i32
    return %c0_i32, %c0_i32_0 : i32, i32
  }
  func.func @transform_2(%arg0: i32) -> (i32, i32) {
    %c0_i32 = arith.constant 0 : i32
    %c0_i32_0 = arith.constant 0 : i32
    return %arg0, %c0_i32 : i32, i32
  }
}

</mosaic_0001>

<bundles_post_ra>
// kernel: tpu_custom_call.1
= control target key start
LH: loop header
LB: loop body
LE: loop exit
PB: predicated region body
PF: predicated region fallthrough
CT: control target
= control target key end

     0   :  { %7 = vsyncpa [#allocation3], 0  ;;  %s545_s0 = inlined_call_operand.hbm [shape: bf16[128,128], index: 0, kind: input, shape index: {}]   ;;  %s546_s1 = inlined_call_operand.hbm [shape: bf16[128,128], index: 1, kind: input, shape index: {}]   ;;  %s547_s2 = inlined_call_operand.hbm [shape: bf16[128,128], index: 2, kind: output, shape index: {}]  }
   0x1   :  { %8 = vsyncpa [#allocation6], 0 }
   0x2   :  { %9 = vsyncpa [#allocation4], 0  ;;  %s14_s11 = sshll.u32 %s545_s0, 4  ;;  %s507_s12 = smov [#allocation2]   ;;  %s15_s11 = int_to_ptr.hbm [resolvable:$true] %s14_s11 }
   0x3   :  { %s16_s13 = sshll.u32 %s507_s12, 4  ;;  %s27_s16 = sshll.u32 %s546_s1, 4  ;;  %s17_s13 = int_to_ptr.vmem [resolvable:$true] %s16_s13  ;;  %s28_s16 = int_to_ptr.hbm [resolvable:$true] %s27_s16 }
   0x4   :  { %s508_s17 = smov 64   ;;  %s509_s18 = smov 4  }
   0x5   :  { %22 = dma.hbm_to_vmem [thread:$0]  %s15_s11, 1024, %s17_s13, [#allocation3], %s508_s17, %s508_s17, %s509_s18  }
   0x6   :  { %s510_s19 = smov [#allocation5]  }
   0x7   :  { %s29_s20 = sshll.u32 %s510_s19, 4  ;;  %s30_s20 = int_to_ptr.vmem [resolvable:$true] %s29_s20 }
   0x8   :  { %35 = dma.hbm_to_vmem [thread:$0]  %s28_s16, 1024, %s30_s20, [#allocation6], %s508_s17, %s508_s17, %s509_s18  }
   0x9   :  { %501 = dma.done.wait [#allocation3], 1024  }
   0xa   :  { %502 = vsyncadd [#allocation3], 4294966272 }
   0xb   :  { %503 = dma.done.wait [#allocation6], 1024  }
   0xc   :  { %504 = vsyncadd [#allocation6], 4294966272  ;;  %v352_v0 = vld [vmem:[#allocation5 + $0x38] sm:$0xff]  ;;  %v351_v1 = vld [vmem:[#allocation5 + $0x30] sm:$0xff]  ;;  %s511_s0 = smov [#allocation7]   ;;  %s259_s23 = sshll.u32 %s547_s2, 4  ;;  %s260_s23 = int_to_ptr.hbm [resolvable:$true] %s259_s23 }
   0xd   :  { %172 = vmatpush.bf16.msra.mxu0 %v352_v0  ;;  %400 = vmatpush.bf16.msra.mxu1 %v352_v0  ;;  %v350_v2 = vld [vmem:[#allocation5 + $0x28] sm:$0xff]  ;;  %v349_v3 = vld [vmem:[#allocation5 + $0x20] sm:$0xff]  ;;  %v348_v4 = vld [vmem:[#allocation5 + $0x18] sm:$0xff]  ;;  %s257_s1 = sshll.u32 %s511_s0, 4  ;;  %s258_s1 = int_to_ptr.vmem [resolvable:$true] %s257_s1 }
   0xe   :  { %401 = vmatpush.bf16.msra.mxu2 %v352_v0  ;;  %402 = vmatpush.bf16.msra.mxu3 %v352_v0  ;;  %v347_v5 = vld [vmem:[#allocation5 + $0x10] sm:$0xff]  ;;  %v346_v6 = vld [vmem:[#allocation5 + $0x8] sm:$0xff]  ;;  %v345_v7 = vld [vmem:[#allocation5] sm:$0xff] }
   0xf   :  { %v337_v8 = vld [vmem:[#allocation2] sm:$0xff]  ;;  %v339_v9 = vld [vmem:[#allocation2 + $0x10] sm:$0xff]  ;;  %v338_v12 = vld [vmem:[#allocation2 + $0x8] sm:$0xff] }
  0x10   :  { %v341_v10 = vld [vmem:[#allocation2 + $0x20] sm:$0xff]  ;;  %v343_v11 = vld [vmem:[#allocation2 + $0x30] sm:$0xff]  ;;  %v340_v13 = vld [vmem:[#allocation2 + $0x18] sm:$0xff] }
  0x11   :  { %173 = vmatpush.bf16.msra.mxu0 %v351_v1  ;;  %403 = vmatpush.bf16.msra.mxu1 %v351_v1  ;;  %v342_v14 = vld [vmem:[#allocation2 + $0x28] sm:$0xff]  ;;  %v344_v15 = vld [vmem:[#allocation2 + $0x38] sm:$0xff] }
  0x12   :  { %404 = vmatpush.bf16.msra.mxu2 %v351_v1  ;;  %405 = vmatpush.bf16.msra.mxu3 %v351_v1 }
  0x15   :  { %174 = vmatpush.bf16.msra.mxu0 %v350_v2  ;;  %406 = vmatpush.bf16.msra.mxu1 %v350_v2 }
  0x16   :  { %407 = vmatpush.bf16.msra.mxu2 %v350_v2  ;;  %408 = vmatpush.bf16.msra.mxu3 %v350_v2 }
  0x19   :  { %175 = vmatpush.bf16.msra.mxu0 %v349_v3  ;;  %409 = vmatpush.bf16.msra.mxu1 %v349_v3 }
  0x1a   :  { %410 = vmatpush.bf16.msra.mxu2 %v349_v3  ;;  %411 = vmatpush.bf16.msra.mxu3 %v349_v3 }
  0x1d   :  { %176 = vmatpush.bf16.msra.mxu0 %v348_v4  ;;  %412 = vmatpush.bf16.msra.mxu1 %v348_v4 }
  0x1e   :  { %413 = vmatpush.bf16.msra.mxu2 %v348_v4  ;;  %414 = vmatpush.bf16.msra.mxu3 %v348_v4 }
  0x21   :  { %177 = vmatpush.bf16.msra.mxu0 %v347_v5  ;;  %415 = vmatpush.bf16.msra.mxu1 %v347_v5 }
  0x22   :  { %416 = vmatpush.bf16.msra.mxu2 %v347_v5  ;;  %417 = vmatpush.bf16.msra.mxu3 %v347_v5 }
  0x25   :  { %178 = vmatpush.bf16.msra.mxu0 %v346_v6  ;;  %418 = vmatpush.bf16.msra.mxu1 %v346_v6 }
  0x26   :  { %419 = vmatpush.bf16.msra.mxu2 %v346_v6  ;;  %420 = vmatpush.bf16.msra.mxu3 %v346_v6 }
  0x29   :  { %179 = vmatpush.bf16.msra.mxu0 %v345_v7  ;;  %421 = vmatpush.bf16.msra.mxu1 %v345_v7 }
  0x2a   :  { %422 = vmatpush.bf16.msra.mxu2 %v345_v7  ;;  %423 = vmatpush.bf16.msra.mxu3 %v345_v7 }
  0x2c   :  { %180 = vmatmul.bf16.vlgmr.msra.gmra.mxu0 %v337_v8  ;;  %190 = vmatmul.bf16.vlgmr.msra.gmra.mxu1 %v339_v9 }
  0x2d   :  { %200 = vmatmul.bf16.vlgmr.msra.gmra.mxu2 %v341_v10  ;;  %210 = vmatmul.bf16.vlgmr.msra.gmra.mxu3 %v343_v11 }
  0x3c   :  { %185 = vmatmul.bf16.gmra.mxu0 %v338_v12  ;;  %195 = vmatmul.bf16.gmra.mxu1 %v340_v13 }
  0x3d   :  { %205 = vmatmul.bf16.gmra.mxu2 %v342_v14  ;;  %215 = vmatmul.bf16.gmra.mxu3 %v344_v15 }
  0xa9   :  { %v181_v16 = vpop.f32.mrf.mxu0  ;;  %v191_v17 = vpop.f32.mrf.mxu1 }
  0xb0   :  { %v201_v18 = vpop.f32.mrf.mxu2  ;;  %v211_v19 = vpop.f32.mrf.mxu3 }
  0xb1   :  { %v183_v20 = vpop.f32.mrf.mxu0  ;;  %v193_v21 = vpop.f32.mrf.mxu1 }
  0xb2   :  { %v356_v22 = vpack.c.bf16 %v183_v20, %v181_v16  ;;  %v366_v23 = vpack.c.bf16 %v193_v21, %v191_v17 }
  0xb4   :  { %357 = vst [vmem:[#allocation7] sm:$0xff] %v356_v22  }
  0xb5   :  { %394 = vst [vmem:[#allocation7 + $0x10] sm:$0xff] %v366_v23  }
  0xb8   :  { %v203_v24 = vpop.f32.mrf.mxu2  ;;  %v213_v25 = vpop.f32.mrf.mxu3 }
  0xb9   :  { %v376_v26 = vpack.c.bf16 %v203_v24, %v201_v18  ;;  %v386_v27 = vpack.c.bf16 %v213_v25, %v211_v19  ;;  %v186_v28 = vpop.f32.mrf.mxu0  ;;  %v196_v29 = vpop.f32.mrf.mxu1 }
  0xbb   :  { %396 = vst [vmem:[#allocation7 + $0x20] sm:$0xff] %v376_v26  }
  0xbc   :  { %398 = vst [vmem:[#allocation7 + $0x30] sm:$0xff] %v386_v27  }
  0xc0   :  { %v206_v30 = vpop.f32.mrf.mxu2  ;;  %v216_v31 = vpop.f32.mrf.mxu3 }
  0xc1   :  { %v188_v32 = vpop.f32.mrf.mxu0  ;;  %v198_v33 = vpop.f32.mrf.mxu1 }
  0xc2   :  { %v361_v34 = vpack.c.bf16 %v188_v32, %v186_v28  ;;  %v371_v35 = vpack.c.bf16 %v198_v33, %v196_v29 }
  0xc4   :  { %393 = vst [vmem:[#allocation7 + $0x8] sm:$0xff] %v361_v34  }
  0xc5   :  { %395 = vst [vmem:[#allocation7 + $0x18] sm:$0xff] %v371_v35  }
  0xc8   :  { %v208_v36 = vpop.f32.mrf.mxu2  ;;  %v218_v37 = vpop.f32.mrf.mxu3 }
  0xc9   :  { %v381_v38 = vpack.c.bf16 %v208_v36, %v206_v30  ;;  %v391_v39 = vpack.c.bf16 %v218_v37, %v216_v31 }
  0xcb   :  { %397 = vst [vmem:[#allocation7 + $0x28] sm:$0xff] %v381_v38  }
  0xcc   :  { %399 = vst [vmem:[#allocation7 + $0x38] sm:$0xff] %v391_v39  }
  0xcd   :  { %265 = dma.vmem_to_hbm [thread:$0]  %s258_s1, 1024, %s260_s23, [#allocation4], %s508_s17, %s508_s17, %s509_s18  }
  0xce   :  { %505 = dma.done.wait [#allocation4], 1024  }
  0xcf   :  { %506 = vsyncadd [#allocation4], 4294966272 }
  0xd0   :  { %270 = vsyncpa [#allocation3], 1 }
  0xd1   :  { %271 = vsyncpa [#allocation6], 1 }
  0xd2   :  { %272 = vsyncpa [#allocation4], 1 }

</bundles_post_ra>
